<compile_context>
chip_gen: v7x
topology: tpu7x:2x2x1
jax: 0.10.0
libtpu: 0.0.40
codegen_flags: <defaults>
</compile_context>

<pallas_src>
import functools

import jax
import jax.numpy as jnp
from jax.experimental import pallas as pl
from jax.experimental.pallas import tpu as pltpu

_HIGHEST = jax.lax.Precision.HIGHEST


def _pick_block_rows(rows, row_bytes, target_bytes=2 * 1024 * 1024):
    """~target_bytes per input tile, multiple of 8 rows (or full extent), and when possible
    at least 2 grid blocks so v7x megacore can split the parallel row axis."""
    if rows <= 8:
        return rows
    target_rows = max(8, target_bytes // max(row_bytes, 1))
    tm = max(8, (target_rows // 8) * 8)
    if tm >= rows:
        if rows >= 16:
            tm = max(8, (rows // 2 // 8) * 8)
        else:
            return rows  # full extent, single block
    return min(tm, rows)


def _ln_folded_kernel(x_ref, gamma_ref, beta_ref, seg_ref, segt_ref, o_ref, *, eps, inv_d):
    # x_ref: (tm, 128); each vreg row holds G original rows of D features (lane-dense).
    x = x_ref[...].astype(jnp.float32)
    seg = seg_ref[...]      # (128, G) one-hot segment matrix
    segt = segt_ref[...]    # (G, 128)
    dims = (((1,), (0,)), ((), ()))
    # Segmented sums via MXU (free slots for this mem-bound kernel); one pass over x.
    s1 = jax.lax.dot_general(x, seg, dims, precision=_HIGHEST,
                             preferred_element_type=jnp.float32)          # (tm, G)
    s2 = jax.lax.dot_general(x * x, seg, dims, precision=_HIGHEST,
                             preferred_element_type=jnp.float32)          # (tm, G)
    mean = s1 * inv_d
    var = jnp.maximum(s2 * inv_d - mean * mean, 0.0)
    inv = jax.lax.rsqrt(var + eps)                                         # (tm, G)
    # Broadcast per-segment stats back to the 128 lanes via the transposed one-hot.
    mean_b = jax.lax.dot_general(mean, segt, dims, precision=_HIGHEST,
                                 preferred_element_type=jnp.float32)       # (tm, 128)
    inv_b = jax.lax.dot_general(inv, segt, dims, precision=_HIGHEST,
                                preferred_element_type=jnp.float32)        # (tm, 128)
    scale = inv_b * gamma_ref[...]
    o_ref[...] = ((x - mean_b) * scale + beta_ref[...]).astype(o_ref.dtype)


def _ln_rows_kernel(x_ref, gamma_ref, beta_ref, o_ref, *, eps, inv_d):
    # General path: x_ref (tm, D), reduce over the lane (feature) axis.
    x = x_ref[...].astype(jnp.float32)
    s1 = jnp.sum(x, axis=-1, keepdims=True)
    s2 = jnp.sum(x * x, axis=-1, keepdims=True)
    mean = s1 * inv_d
    var = jnp.maximum(s2 * inv_d - mean * mean, 0.0)
    inv = jax.lax.rsqrt(var + eps)
    scale = inv * gamma_ref[...]
    o_ref[...] = ((x - mean) * scale + beta_ref[...]).astype(o_ref.dtype)


def layer_norm(x, gamma, beta, *, eps=1e-6):
    """LayerNorm over the last axis of x with affine params gamma/beta of shape [D]."""
    orig_shape = x.shape
    D = orig_shape[-1]
    rows = 1
    for s in orig_shape[:-1]:
        rows *= s

    x2 = x.reshape(rows, D)                              # free view (row-major), no HBM copy
    gamma_f = gamma.astype(jnp.float32).reshape(1, D)    # cast hoisted out of the kernel
    beta_f = beta.astype(jnp.float32).reshape(1, D)

    compiler_params = pltpu.CompilerParams(
        dimension_semantics=("parallel",),
        vmem_limit_bytes=32 * 1024 * 1024,
    )

    fold = (D < 128) and (128 % D == 0) and (rows % (128 // D) == 0)
    if fold:
        G = 128 // D
        W = 128
        R = rows // G
        x_wide = x2.reshape(R, W)                         # free view: lane-dense layout
        gamma_w = jnp.tile(gamma_f, (1, G))               # (1, 128)
        beta_w = jnp.tile(beta_f, (1, G))
        lane_seg = jnp.arange(W, dtype=jnp.int32)[:, None] // D
        seg = (lane_seg == jnp.arange(G, dtype=jnp.int32)[None, :]).astype(jnp.float32)  # (128, G)
        seg_t = jnp.transpose(seg)                                                       # (G, 128)

        tm = _pick_block_rows(R, W * 4)
        grid = (pl.cdiv(R, tm),)                          # no explicit padding; ragged last block ok
        out = pl.pallas_call(
            functools.partial(_ln_folded_kernel, eps=float(eps), inv_d=1.0 / D),
            out_shape=jax.ShapeDtypeStruct((R, W), x.dtype),
            grid_spec=pltpu.PrefetchScalarGridSpec(
                num_scalar_prefetch=0,
                grid=grid,
                in_specs=[
                    pl.BlockSpec((tm, W), lambda i: (i, 0)),
                    pl.BlockSpec((1, W), lambda i: (0, 0)),
                    pl.BlockSpec((1, W), lambda i: (0, 0)),
                    pl.BlockSpec((W, G), lambda i: (0, 0)),
                    pl.BlockSpec((G, W), lambda i: (0, 0)),
                ],
                out_specs=pl.BlockSpec((tm, W), lambda i: (i, 0)),
            ),
            compiler_params=compiler_params,
        )(x_wide, gamma_w, beta_w, seg, seg_t)
        return out.reshape(orig_shape)

    # General path (D >= 128 or D does not divide 128).
    tm = _pick_block_rows(rows, D * 4)
    grid = (pl.cdiv(rows, tm),)
    out = pl.pallas_call(
        functools.partial(_ln_rows_kernel, eps=float(eps), inv_d=1.0 / D),
        out_shape=jax.ShapeDtypeStruct((rows, D), x.dtype),
        grid_spec=pltpu.PrefetchScalarGridSpec(
            num_scalar_prefetch=0,
            grid=grid,
            in_specs=[
                pl.BlockSpec((tm, D), lambda i: (i, 0)),
                pl.BlockSpec((1, D), lambda i: (0, 0)),
                pl.BlockSpec((1, D), lambda i: (0, 0)),
            ],
            out_specs=pl.BlockSpec((tm, D), lambda i: (i, 0)),
        ),
        compiler_params=compiler_params,
    )(x2, gamma_f, beta_f)
    return out.reshape(orig_shape)


if __name__ == "__main__":
    # Module: LayerNormalization(dim_model=32); input [batch=2, seq=8, dim_model=32]
    dim_model = 32
    batch, seq = 2, 8
    key = jax.random.PRNGKey(0)
    x = jax.random.normal(key, (batch, seq, dim_model), dtype=jnp.float32)

    # nn.Parameter(torch.ones(dim_model)) / torch.zeros(dim_model)
    gamma = jnp.ones((dim_model,), dtype=jnp.float32)
    beta = jnp.zeros((dim_model,), dtype=jnp.float32)

    out = layer_norm(x, gamma, beta, eps=1e-6)
    out = jax.block_until_ready(out)

    # reference check in plain JAX (matches PyTorch forward: biased var, eps in sqrt)
    mean = jnp.mean(x, axis=-1, keepdims=True)
    var = jnp.mean((x - mean) ** 2, axis=-1, keepdims=True)
    ref = gamma * (x - mean) / jnp.sqrt(var + 1e-6) + beta
    assert jnp.allclose(out, ref, atol=1e-5, rtol=1e-5), "mismatch vs reference"

    print("KERNEL_OK")
</pallas_src>

<mosaic_0001>
module attributes {stable_mosaic.version = 11 : i64} {
  func.func @_ln_folded_kernel(%arg0: i32, %arg1: memref<4x128xf32, #tpu.memory_space<vmem>>, %arg2: memref<1x128xf32, #tpu.memory_space<vmem>>, %arg3: memref<1x128xf32, #tpu.memory_space<vmem>>, %arg4: memref<128x4xf32, #tpu.memory_space<vmem>>, %arg5: memref<4x128xf32, #tpu.memory_space<vmem>>, %arg6: memref<4x128xf32, #tpu.memory_space<vmem>>) attributes {dimension_semantics = [#tpu.dimension_semantics<parallel>], iteration_bounds = array<i64: 1>, scalar_prefetch = 0 : i64, scratch_operands = 0 : i64, tpu.core_type = #tpu.core_type<tc>, window_params = [{transform_indices = @transform_0, window_bounds = array<i64: 4, 128>}, {pipeline_mode = #tpu.pipeline_mode<synchronous>, transform_indices = @transform_1, window_bounds = array<i64: 1, 128>}, {pipeline_mode = #tpu.pipeline_mode<synchronous>, transform_indices = @transform_2, window_bounds = array<i64: 1, 128>}, {pipeline_mode = #tpu.pipeline_mode<synchronous>, transform_indices = @transform_3, window_bounds = array<i64: 128, 4>}, {pipeline_mode = #tpu.pipeline_mode<synchronous>, transform_indices = @transform_4, window_bounds = array<i64: 4, 128>}, {transform_indices = @transform_5, window_bounds = array<i64: 4, 128>}]} {
    %c0 = arith.constant 0 : index
    %c0_0 = arith.constant 0 : index
    %0 = vector.load %arg1[%c0, %c0_0] : memref<4x128xf32, #tpu.memory_space<vmem>>, vector<4x128xf32>
    %c0_1 = arith.constant 0 : index
    %c0_2 = arith.constant 0 : index
    %1 = vector.load %arg4[%c0_1, %c0_2] : memref<128x4xf32, #tpu.memory_space<vmem>>, vector<128x4xf32>
    %c0_3 = arith.constant 0 : index
    %c0_4 = arith.constant 0 : index
    %2 = vector.load %arg5[%c0_3, %c0_4] : memref<4x128xf32, #tpu.memory_space<vmem>>, vector<4x128xf32>
    %cst = arith.constant dense<0.000000e+00> : vector<4x4xf32>
    %3 = tpu.matmul %0, %1, %cst {dimension_numbers = #tpu.dot_dimension_numbers<[1], [0], [0], [1], [0, 0, 1, 1], [], []>, precision = #tpu.contract_precision<fp32>} : vector<4x128xf32>, vector<128x4xf32>, vector<4x4xf32> -> vector<4x4xf32>
    %4 = arith.mulf %0, %0 : vector<4x128xf32>
    %cst_5 = arith.constant dense<0.000000e+00> : vector<4x4xf32>
    %5 = tpu.matmul %4, %1, %cst_5 {dimension_numbers = #tpu.dot_dimension_numbers<[1], [0], [0], [1], [0, 0, 1, 1], [], []>, precision = #tpu.contract_precision<fp32>} : vector<4x128xf32>, vector<128x4xf32>, vector<4x4xf32> -> vector<4x4xf32>
    %cst_6 = arith.constant 3.125000e-02 : f32
    %6 = vector.broadcast %cst_6 : f32 to vector<4x4xf32>
    %7 = arith.mulf %3, %6 : vector<4x4xf32>
    %cst_7 = arith.constant 3.125000e-02 : f32
    %8 = vector.broadcast %cst_7 : f32 to vector<4x4xf32>
    %9 = arith.mulf %5, %8 : vector<4x4xf32>
    %10 = arith.mulf %7, %7 : vector<4x4xf32>
    %11 = arith.subf %9, %10 : vector<4x4xf32>
    %cst_8 = arith.constant 0.000000e+00 : f32
    %12 = vector.broadcast %cst_8 : f32 to vector<4x4xf32>
    %13 = arith.maximumf %11, %12 : vector<4x4xf32>
    %cst_9 = arith.constant 9.99999997E-7 : f32
    %14 = vector.broadcast %cst_9 : f32 to vector<4x4xf32>
    %15 = arith.addf %13, %14 : vector<4x4xf32>
    %16 = math.rsqrt %15 : vector<4x4xf32>
    %cst_10 = arith.constant dense<0.000000e+00> : vector<4x128xf32>
    %17 = tpu.matmul %7, %2, %cst_10 {dimension_numbers = #tpu.dot_dimension_numbers<[1], [0], [0], [1], [0, 0, 1, 1], [], []>, precision = #tpu.contract_precision<fp32>} : vector<4x4xf32>, vector<4x128xf32>, vector<4x128xf32> -> vector<4x128xf32>
    %cst_11 = arith.constant dense<0.000000e+00> : vector<4x128xf32>
    %18 = tpu.matmul %16, %2, %cst_11 {dimension_numbers = #tpu.dot_dimension_numbers<[1], [0], [0], [1], [0, 0, 1, 1], [], []>, precision = #tpu.contract_precision<fp32>} : vector<4x4xf32>, vector<4x128xf32>, vector<4x128xf32> -> vector<4x128xf32>
    %c0_12 = arith.constant 0 : index
    %c0_13 = arith.constant 0 : index
    %19 = vector.load %arg2[%c0_12, %c0_13] : memref<1x128xf32, #tpu.memory_space<vmem>>, vector<1x128xf32>
    %20 = vector.broadcast %19 : vector<1x128xf32> to vector<4x128xf32>
    %21 = arith.mulf %18, %20 : vector<4x128xf32>
    %22 = arith.subf %0, %17 : vector<4x128xf32>
    %23 = arith.mulf %22, %21 : vector<4x128xf32>
    %c0_14 = arith.constant 0 : index
    %c0_15 = arith.constant 0 : index
    %24 = vector.load %arg3[%c0_14, %c0_15] : memref<1x128xf32, #tpu.memory_space<vmem>>, vector<1x128xf32>
    %25 = vector.broadcast %24 : vector<1x128xf32> to vector<4x128xf32>
    %26 = arith.addf %23, %25 : vector<4x128xf32>
    %c0_16 = arith.constant 0 : index
    %c0_17 = arith.constant 0 : index
    %27 = vector.load %arg6[%c0_16, %c0_17] : memref<4x128xf32, #tpu.memory_space<vmem>>, vector<4x128xf32>
    tpu.vector_store %arg6[%c0_16, %c0_17], %26 {strides = array<i32>} : memref<4x128xf32, #tpu.memory_space<vmem>>, vector<4x128xf32>,
    return
  }
  func.func @transform_0(%arg0: i32) -> (i32, i32) {
    %c0_i32 = arith.constant 0 : i32
    %c0_i32_0 = arith.constant 0 : i32
    return %arg0, %c0_i32 : i32, i32
  }
  func.func @transform_1(%arg0: i32) -> (i32, i32) {
    %c0_i32 = arith.constant 0 : i32
    %c0_i32_0 = arith.constant 0 : i32
    %c0_i32_1 = arith.constant 0 : i32
    return %c0_i32, %c0_i32_0 : i32, i32
  }
  func.func @transform_2(%arg0: i32) -> (i32, i32) {
    %c0_i32 = arith.constant 0 : i32
    %c0_i32_0 = arith.constant 0 : i32
    %c0_i32_1 = arith.constant 0 : i32
    return %c0_i32, %c0_i32_0 : i32, i32
  }
  func.func @transform_3(%arg0: i32) -> (i32, i32) {
    %c0_i32 = arith.constant 0 : i32
    %c0_i32_0 = arith.constant 0 : i32
    %c0_i32_1 = arith.constant 0 : i32
    return %c0_i32, %c0_i32_0 : i32, i32
  }
  func.func @transform_4(%arg0: i32) -> (i32, i32) {
    %c0_i32 = arith.constant 0 : i32
    %c0_i32_0 = arith.constant 0 : i32
    %c0_i32_1 = arith.constant 0 : i32
    return %c0_i32, %c0_i32_0 : i32, i32
  }
  func.func @transform_5(%arg0: i32) -> (i32, i32) {
    %c0_i32 = arith.constant 0 : i32
    %c0_i32_0 = arith.constant 0 : i32
    return %arg0, %c0_i32 : i32, i32
  }
}

</mosaic_0001>

<bundles_post_ra>
// kernel: tpu_custom_call.1
= control target key start
LH: loop header
LB: loop body
LE: loop exit
PB: predicated region body
PF: predicated region fallthrough
CT: control target
= control target key end

     0   :  { %v3333_v3 = vmov 0.0|0.0   ;;  %vm3334_vm0 = vmmov 0   ;;  %v3335_v11 = vmov 0.0   ;;  %s3854_s0 = inlined_call_operand.vmem [shape: f32[4,128], index: 0, kind: input, shape index: {}]   ;;  %s3855_s1 = inlined_call_operand.vmem [shape: f32[1,128], index: 1, kind: input, shape index: {}]   ;;  %s3856_s2 = inlined_call_operand.vmem [shape: f32[1,128], index: 2, kind: input, shape index: {}]   ;;  %s3857_s3 = inlined_call_operand.vmem [shape: f32[128,4], index: 3, kind: input, shape index: {}]   ;;  %s3858_s4 = inlined_call_operand.vmem [shape: f32[4,128], index: 4, kind: input, shape index: {}]   ;;  %s3859_s5 = inlined_call_operand.hbm [shape: f32[4,128], index: 5, kind: output, shape index: {}]  }
   0x1   :  { %v22_v0 = vld [vmem:[%s3857_s3] sm:$0xff]  ;;  %v23_v1 = vld [vmem:[%s3857_s3 + $0x8] sm:$0xff]  ;;  %v24_v2 = vld [vmem:[%s3857_s3 + $0x10] sm:$0xff]  ;;  %2975 = vmatprep.subr.bf16.mxu0 %v3333_v3  ;;  %3119 = vmatprep.subr.bf16.mxu1 %v3333_v3 }
   0x2   :  { %v40_v4 = vand.u32 4294901760, %v22_v0  ;;  %v43_v5 = vand.u32 4294901760, %v23_v1  ;;  %v3381_v6 = vld [vmem:[%s3857_s3 + $0x18] sm:$0xff]  ;;  %v46_v7 = vand.u32 4294901760, %v24_v2  ;;  %v3387_v9 = vld [vmem:[%s3857_s3 + $0x20] sm:$0xff]  ;;  %v3392_v10 = vld [vmem:[%s3857_s3 + $0x28] sm:$0xff]  ;;  %2527 = vmatprep.mubr.msk.f32.mxu0 %vm3334_vm0, %v3335_v11  ;;  %2737 = vmatprep.mubr.msk.f32.mxu1 %vm3334_vm0, %v3335_v11 }
   0x3   :  { %v49_v8 = vand.u32 4294901760, %v3381_v6  ;;  %v52_v14 = vand.u32 4294901760, %v3387_v9  ;;  %v55_v15 = vand.u32 4294901760, %v3392_v10  ;;  %v3413_v16 = vld [vmem:[%s3857_s3 + $0x30] sm:$0xff]  ;;  %v3418_v17 = vld [vmem:[%s3857_s3 + $0x38] sm:$0xff] }
   0x4   :  { %v3398_v12 = vpack.c.bf16 %v43_v5, %v40_v4 }
   0x5   :  { %v3404_v13 = vpack.c.bf16 %v49_v8, %v46_v7 }
   0x6   :  { %2977 = vmatpush3.bf16.msra.mxu0 %v3398_v12  ;;  %3121 = vmatpush3.bf16.msra.mxu1 %v3398_v12 }
   0x7   :  { %2978 = vmatprep.subr.bf16.mxu0 %v3333_v3  ;;  %3122 = vmatprep.subr.bf16.mxu1 %v3333_v3 }
   0x8   :  { %10 = vsyncpa [#allocation3], 0  ;;  %v3423_v18 = vld [vmem:[%s3854_s0] sm:$0xf]  ;;  %v3427_v19 = vpack.c.bf16 %v55_v15, %v52_v14  ;;  %v58_v20 = vand.u32 4294901760, %v3413_v16  ;;  %v61_v21 = vand.u32 4294901760, %v3418_v17  ;;  %v3466_v35 = vsub.f32 %v22_v0, %v40_v4 }
   0x9   :  { %v30_v22 = vld [vmem:[%s3857_s3 + $0x40] sm:$0xff]  ;;  %v31_v23 = vld [vmem:[%s3857_s3 + $0x48] sm:$0xff]  ;;  %v3440_v24 = vand.u32 4294901760, %v3423_v18  ;;  %v680_v25 = vmul.f32 %v3423_v18, %v3423_v18  ;;  %v32_v26 = vld [vmem:[%s3857_s3 + $0x50] sm:$0xff]  ;;  %v3474_v37 = vsub.f32 %v23_v1, %v43_v5  ;;  %v3476_v38 = vsub.f32 %v24_v2, %v46_v7  ;;  %s3336_s30 = smov [#allocation2]  }
   0xa   :  { %2980 = vmatpush3.bf16.msra.mxu0 %v3404_v13  ;;  %3124 = vmatpush3.bf16.msra.mxu1 %v3404_v13  ;;  %v33_v27 = vld [vmem:[%s3857_s3 + $0x58] sm:$0xff]  ;;  %v34_v28 = vld [vmem:[%s3857_s3 + $0x60] sm:$0xff]  ;;  %v3455_v29 = vpack.c.bf16 %v61_v21, %v58_v20  ;;  %v64_v30 = vand.u32 4294901760, %v30_v22  ;;  %v67_v31 = vand.u32 4294901760, %v31_v23  ;;  %v35_v32 = vld [vmem:[%s3857_s3 + $0x68] sm:$0xff]  ;;  %v70_v39 = vand.u32 4294901760, %v32_v26 }
   0xb   :  { %2981 = vmatprep.subr.bf16.mxu0 %v3333_v3  ;;  %3125 = vmatprep.subr.bf16.mxu1 %v3333_v3  ;;  %v36_v33 = vld [vmem:[%s3857_s3 + $0x70] sm:$0xff]  ;;  %v37_v34 = vld [vmem:[%s3857_s3 + $0x78] sm:$0xff]  ;;  %v3472_v36 = vsub.f32 %v3423_v18, %v3440_v24  ;;  %v73_v40 = vand.u32 4294901760, %v33_v27  ;;  %v3478_v41 = vand.u32 4294901760, %v680_v25  ;;  %v76_v42 = vand.u32 4294901760, %v34_v28  ;;  %s2257_s6 = sshll.u32 %s3336_s30, 4  ;;  %s2258_s6 = int_to_ptr.vmem [resolvable:$true] %s2257_s6 }
   0xc   :  { %v79_v43 = vand.u32 4294901760, %v35_v32  ;;  %v82_v44 = vand.u32 4294901760, %v36_v33  ;;  %v85_v45 = vand.u32 4294901760, %v37_v34  ;;  %v3482_v46 = vpack.c.bf16 %v67_v31, %v64_v30  ;;  %s3309_s7 = scalar_lea.vmem %s2258_s6, 64  ;;  %p3314_p1 = scmp.lt.s32.totalorder %s2258_s6, %s2258_s6 }
   0xd   :  { %v133_v47 = vand.u32 4294901760, %v3466_v35  ;;  %v3861_v48 = vand.u32 4294901760, %v3472_v36  ;;  %v140_v49 = vand.u32 4294901760, %v3474_v37  ;;  %v147_v50 = vand.u32 4294901760, %v3476_v38  ;;  %p3310_p0 = scmp.ne.s32.totalorder %s2258_s6, %s3309_s7  ;;  %p3315_p2 = scmp.lt.s32.totalorder %s3309_s7, %s3309_s7 }
   0xe   :  { %2983 = vmatpush3.bf16.msra.mxu0 %v3427_v19  ;;  %3127 = vmatpush3.bf16.msra.mxu1 %v3427_v19  ;;  %v3493_v51 = vsub.f32 %v3381_v6, %v49_v8  ;;  %v3496_v52 = vsub.f32 %v680_v25, %v3478_v41  ;;  %v3498_v53 = vpack.c.bf16 %v73_v40, %v70_v39  ;;  %vm1333_vm1 = vcmask 1043456  }
   0xf   :  { %2984 = vmatprep.subr.bf16.mxu0 %v3333_v3  ;;  %3128 = vmatprep.subr.bf16.mxu1 %v3333_v3  ;;  %v3500_v54 = vpack.c.bf16 %v79_v43, %v76_v42  ;;  %v3502_v55 = vpack.c.bf16 %v85_v45, %v82_v44  ;;  %v134_v56 = vsub.f32 %v3466_v35, %v133_v47  ;;  %vm1329_vm2 = vcmask 31744   ;;  %p3316_p3 = por %p3315_p2, %p3314_p1 }
  0x10   :  { %v3508_v57 = vsub.f32 %v3387_v9, %v52_v14  ;;  %v3511_v58 = vsub.f32 %v3392_v10, %v55_v15  ;;  %v123_v59 = vsub.f32 %v3472_v36, %v3861_v48  ;;  %v141_v60 = vsub.f32 %v3474_v37, %v140_v49 }
  0x11   :  { %v3520_v61 = vsub.f32 %v3476_v38, %v147_v50  ;;  %v154_v62 = vand.u32 4294901760, %v3493_v51  ;;  %v3860_v63 = vand.u32 4294901760, %v3496_v52  ;;  %v3525_v0 = vsub.f32 %v3413_v16, %v58_v20  ;;  %p3317_p4 = pnand %p3316_p3, %p3310_p0 }
  0x12   :  { %2986 = vmatpush3.bf16.msra.mxu0 %v3455_v29  ;;  %3130 = vmatpush3.bf16.msra.mxu1 %v3455_v29  ;;  %v3528_v1 = vsub.f32 %v3418_v17, %v61_v21  ;;  %v3530_v2 = vsub.f32 %v30_v22, %v64_v30  ;;  %v3532_v4 = vsub.f32 %v31_v23, %v67_v31  ;;  %v161_v8 = vand.u32 4294901760, %v3508_v57 }
  0x13   :  { %2987 = vmatprep.subr.bf16.mxu0 %v3333_v3  ;;  %3131 = vmatprep.subr.bf16.mxu1 %v3333_v3  ;;  %v3534_v5 = vsub.f32 %v32_v26, %v70_v39  ;;  %v3536_v6 = vsub.f32 %v33_v27, %v73_v40  ;;  %v3538_v7 = vsub.f32 %v34_v28, %v76_v42  ;;  %v135_v15 = vand.u32 4294901760, %v134_v56 }
  0x14   :  { %v3543_v9 = vsub.f32 %v35_v32, %v79_v43  ;;  %v3545_v10 = vsub.f32 %v36_v33, %v82_v44  ;;  %v3547_v14 = vsub.f32 %v37_v34, %v85_v45  ;;  %v142_v16 = vand.u32 4294901760, %v141_v60 }
  0x15   :  { %v155_v17 = vsub.f32 %v3493_v51, %v154_v62  ;;  %v168_v20 = vand.u32 4294901760, %v3511_v58  ;;  %v765_v21 = vsub.f32 %v3496_v52, %v3860_v63  ;;  %v175_v22 = vand.u32 4294901760, %v3525_v0 }
  0x16   :  { %2989 = vmatpush3.bf16.msra.mxu0 %v3482_v46  ;;  %3133 = vmatpush3.bf16.msra.mxu1 %v3482_v46  ;;  %v182_v23 = vand.u32 4294901760, %v3528_v1  ;;  %v189_v25 = vand.u32 4294901760, %v3530_v2  ;;  %v196_v26 = vand.u32 4294901760, %v3532_v4  ;;  %v203_v27 = vand.u32 4294901760, %v3534_v5 }
  0x17   :  { %2990 = vmatprep.subr.bf16.mxu0 %v3333_v3  ;;  %3134 = vmatprep.subr.bf16.mxu1 %v3333_v3  ;;  %v210_v28 = vand.u32 4294901760, %v3536_v6  ;;  %v217_v30 = vand.u32 4294901760, %v3538_v7  ;;  %v224_v31 = vand.u32 4294901760, %v3543_v9  ;;  %v231_v32 = vand.u32 4294901760, %v3545_v10 }
  0x18   :  { %v3862_v33 = vand.u32 4294901760, %v3547_v14  ;;  %v3568_v34 = vpack.c.bf16 %v140_v49, %v133_v47  ;;  %v3572_v39 = vpack.c.bf16 %v154_v62, %v147_v50  ;;  %v3574_v40 = vpack.c.bf16 %v168_v20, %v161_v8 }
  0x19   :  { %v3576_v42 = vpack.c.bf16 %v182_v23, %v175_v22  ;;  %v3578_v43 = vpack.c.bf16 %v196_v26, %v189_v25  ;;  %v3580_v44 = vpack.c.bf16 %v210_v28, %v203_v27  ;;  %v3582_v45 = vpack.c.bf16 %v224_v31, %v217_v30 }
  0x1a   :  { %2992 = vmatpush3.bf16.msra.mxu0 %v3498_v53  ;;  %3136 = vmatpush3.bf16.msra.mxu1 %v3498_v53  ;;  %v3588_v47 = vpack.c.bf16 %v3862_v33, %v231_v32  ;;  %v124_v49 = vand.u32 4294901760, %v123_v59  ;;  %v766_v56 = vand.u32 4294901760, %v765_v21  ;;  %v162_v50 = vsub.f32 %v3508_v57, %v161_v8 }
  0x1b   :  { %2993 = vmatprep.subr.bf16.mxu0 %v3333_v3  ;;  %3137 = vmatprep.subr.bf16.mxu1 %v3333_v3  ;;  %v169_v60 = vsub.f32 %v3511_v58, %v168_v20  ;;  %v3000_v62 = vpack.c.bf16 %v142_v16, %v135_v15  ;;  %v149_v63 = vand.u32 4294901760, %v3520_v61  ;;  %v156_v48 = vand.u32 4294901760, %v155_v17 }
  0x1c   :  { %v163_v59 = vand.u32 4294901760, %v162_v50  ;;  %v176_v20 = vsub.f32 %v3525_v0, %v175_v22  ;;  %v183_v33 = vsub.f32 %v3528_v1, %v182_v23  ;;  %v204_v17 = vsub.f32 %v3534_v5, %v203_v27 }
  0x1d   :  { %v170_v21 = vand.u32 4294901760, %v169_v60  ;;  %v3003_v8 = vpack.c.bf16 %v156_v48, %v149_v63  ;;  %v190_v48 = vsub.f32 %v3530_v2, %v189_v25  ;;  %v197_v63 = vsub.f32 %v3532_v4, %v196_v26 }
  0x1e   :  { %2995 = vmatpush3.bf16.msra.mxu0 %v3500_v54  ;;  %3139 = vmatpush3.bf16.msra.mxu1 %v3500_v54  ;;  %v177_v15 = vand.u32 4294901760, %v176_v20  ;;  %v184_v16 = vand.u32 4294901760, %v183_v33  ;;  %v218_v25 = vsub.f32 %v3538_v7, %v217_v30  ;;  %v205_v33 = vand.u32 4294901760, %v204_v17  ;;  %v2265_v17 = vld [vmem:[%s3855_s1] ss:$0 sm:$0xff] }
  0x1f   :  { %2996 = vmatprep.subr.bf16.mxu0 %v3333_v3  ;;  %3140 = vmatprep.subr.bf16.mxu1 %v3333_v3  ;;  %v3006_v61 = vpack.c.bf16 %v170_v21, %v163_v59  ;;  %v191_v23 = vand.u32 4294901760, %v190_v48  ;;  %v225_v27 = vsub.f32 %v3543_v9, %v224_v31  ;;  %v232_v30 = vsub.f32 %v3545_v10, %v231_v32 }
  0x20   :  { %v3009_v22 = vpack.c.bf16 %v184_v16, %v177_v15  ;;  %v219_v60 = vand.u32 4294901760, %v218_v25  ;;  %v3863_v59 = vand.u32 4294901760, %v3547_v14  ;;  %v3027_v15 = vpack.c.bf16 %v3493_v51, %v3476_v38  ;;  %v2266_v25 = vld [vmem:[%s3856_s2] ss:$0 sm:$0xff] }
  0x21   :  { %v3036_v38 = vpack.c.bf16 %v3532_v4, %v3530_v2  ;;  %v3039_v51 = vpack.c.bf16 %v3536_v6, %v3534_v5 }
  0x22   :  { %2998 = vmatpush3.bf16.msra.mxu0 %v3502_v55  ;;  %3142 = vmatpush3.bf16.msra.mxu1 %v3502_v55  ;;  %v239_v21 = vsub.f32 %v3547_v14, %v3863_v59 }
  0x23   :  { %2999 = vmatprep.subr.bf16.mxu0 %v3333_v3  ;;  %3143 = vmatprep.subr.bf16.mxu1 %v3333_v3 }
  0x24   :  { %v240_v20 = vand.u32 4294901760, %v239_v21 }
  0x25   :  { %2528 = vmatmul.mubr.f32.vlgmr.msra.gmra.mrb[0].mxu0 %v124_v49  ;;  %2738 = vmatmul.mubr.f32.vlgmr.msra.gmra.mrb[0].mxu1 %v766_v56  ;;  %v198_v49 = vand.u32 4294901760, %v197_v63  ;;  %v211_v56 = vsub.f32 %v3536_v6, %v210_v28 }
  0x26   :  { %3001 = vmatpush3.bf16.msra.mxu0 %v3000_v62  ;;  %3145 = vmatpush3.bf16.msra.mxu1 %v3000_v62  ;;  %v226_v62 = vand.u32 4294901760, %v225_v27 }
  0x27   :  { %3002 = vmatprep.subr.bf16.mxu0 %v3333_v3  ;;  %3146 = vmatprep.subr.bf16.mxu1 %v3333_v3  ;;  %v3012_v26 = vpack.c.bf16 %v198_v49, %v191_v23  ;;  %v212_v50 = vand.u32 4294901760, %v211_v56 }
  0x28   :  { %2562 = vmatprep.mubr.msk.f32.mxu0 %vm3334_vm0, %v3335_v11  ;;  %2772 = vmatprep.mubr.msk.f32.mxu1 %vm3334_vm0, %v3335_v11  ;;  %v3018_v31 = vpack.c.bf16 %v226_v62, %v219_v60 }
  0x29   :  { %v3015_v28 = vpack.c.bf16 %v212_v50, %v205_v33 }
  0x2a   :  { %3004 = vmatpush3.bf16.msra.mxu0 %v3003_v8  ;;  %3148 = vmatpush3.bf16.msra.mxu1 %v3003_v8  ;;  %v233_v8 = vand.u32 4294901760, %v232_v30 }
  0x2b   :  { %3005 = vmatprep.subr.bf16.mxu0 %v3333_v3  ;;  %3149 = vmatprep.subr.bf16.mxu1 %v3333_v3 }
  0x2c   :  { %v3021_v32 = vpack.c.bf16 %v240_v20, %v233_v8 }
  0x2e   :  { %3007 = vmatpush3.bf16.msra.mxu0 %v3006_v61  ;;  %3151 = vmatpush3.bf16.msra.mxu1 %v3006_v61  ;;  %v3024_v61 = vpack.c.bf16 %v3474_v37, %v3466_v35  ;;  %v3030_v35 = vpack.c.bf16 %v3511_v58, %v3508_v57  ;;  %v3033_v37 = vpack.c.bf16 %v3528_v1, %v3525_v0  ;;  %v3864_v0 = vand.u32 4294901760, %v3472_v36 }
  0x2f   :  { %3008 = vmatprep.subr.bf16.mxu0 %v3333_v3  ;;  %3152 = vmatprep.subr.bf16.mxu1 %v3333_v3  ;;  %v3042_v57 = vpack.c.bf16 %v3543_v9, %v3538_v7  ;;  %v3045_v58 = vpack.c.bf16 %v3547_v14, %v3545_v10  ;;  %v3865_v1 = vand.u32 4294901760, %v3496_v52 }
  0x32   :  { %3010 = vmatpush3.bf16.msra.mxu0 %v3009_v22  ;;  %3154 = vmatpush3.bf16.msra.mxu1 %v3009_v22 }
  0x33   :  { %3011 = vmatprep.subr.bf16.mxu0 %v3333_v3  ;;  %3155 = vmatprep.subr.bf16.mxu1 %v3333_v3 }
  0x36   :  { %3013 = vmatpush3.bf16.msra.mxu0 %v3012_v26  ;;  %3157 = vmatpush3.bf16.msra.mxu1 %v3012_v26 }
  0x37   :  { %3014 = vmatprep.subr.bf16.mxu0 %v3333_v3  ;;  %3158 = vmatprep.subr.bf16.mxu1 %v3333_v3 }
  0x3a   :  { %3016 = vmatpush3.bf16.msra.mxu0 %v3015_v28  ;;  %3160 = vmatpush3.bf16.msra.mxu1 %v3015_v28 }
  0x3b   :  { %3017 = vmatprep.subr.bf16.mxu0 %v3333_v3  ;;  %3161 = vmatprep.subr.bf16.mxu1 %v3333_v3 }
  0x3e   :  { %3019 = vmatpush3.bf16.msra.mxu0 %v3018_v31  ;;  %3163 = vmatpush3.bf16.msra.mxu1 %v3018_v31 }
  0x3f   :  { %3020 = vmatprep.subr.bf16.mxu0 %v3333_v3  ;;  %3164 = vmatprep.subr.bf16.mxu1 %v3333_v3 }
  0x42   :  { %3022 = vmatpush3.bf16.msra.mxu0 %v3021_v32  ;;  %3166 = vmatpush3.bf16.msra.mxu1 %v3021_v32 }
  0x43   :  { %3023 = vmatprep.subr.bf16.mxu0 %v3333_v3  ;;  %3167 = vmatprep.subr.bf16.mxu1 %v3333_v3 }
  0x45   :  { %2563 = vmatmul.mubr.f32.vlgmr.msra.gmra.mrb[0].mxu0 %v3440_v24  ;;  %2773 = vmatmul.mubr.f32.vlgmr.msra.gmra.mrb[0].mxu1 %v3478_v41 }
  0x46   :  { %3025 = vmatpush3.bf16.msra.mxu0 %v3024_v61  ;;  %3169 = vmatpush3.bf16.msra.mxu1 %v3024_v61 }
  0x47   :  { %3026 = vmatprep.subr.bf16.mxu0 %v3333_v3  ;;  %3170 = vmatprep.subr.bf16.mxu1 %v3333_v3 }
  0x48   :  { %2597 = vmatprep.mubr.msk.f32.mxu0 %vm3334_vm0, %v3335_v11  ;;  %2807 = vmatprep.mubr.msk.f32.mxu1 %vm3334_vm0, %v3335_v11 }
  0x4a   :  { %3028 = vmatpush3.bf16.msra.mxu0 %v3027_v15  ;;  %3172 = vmatpush3.bf16.msra.mxu1 %v3027_v15 }
  0x4b   :  { %3029 = vmatprep.subr.bf16.mxu0 %v3333_v3  ;;  %3173 = vmatprep.subr.bf16.mxu1 %v3333_v3 }
  0x4e   :  { %3031 = vmatpush3.bf16.msra.mxu0 %v3030_v35  ;;  %3175 = vmatpush3.bf16.msra.mxu1 %v3030_v35 }
  0x4f   :  { %3032 = vmatprep.subr.bf16.mxu0 %v3333_v3  ;;  %3176 = vmatprep.subr.bf16.mxu1 %v3333_v3 }
  0x52   :  { %3034 = vmatpush3.bf16.msra.mxu0 %v3033_v37  ;;  %3178 = vmatpush3.bf16.msra.mxu1 %v3033_v37 }
  0x53   :  { %3035 = vmatprep.subr.bf16.mxu0 %v3333_v3  ;;  %3179 = vmatprep.subr.bf16.mxu1 %v3333_v3 }
  0x56   :  { %3037 = vmatpush3.bf16.msra.mxu0 %v3036_v38  ;;  %3181 = vmatpush3.bf16.msra.mxu1 %v3036_v38 }
  0x57   :  { %3038 = vmatprep.subr.bf16.mxu0 %v3333_v3  ;;  %3182 = vmatprep.subr.bf16.mxu1 %v3333_v3 }
  0x5a   :  { %3040 = vmatpush3.bf16.msra.mxu0 %v3039_v51  ;;  %3184 = vmatpush3.bf16.msra.mxu1 %v3039_v51 }
  0x5b   :  { %3041 = vmatprep.subr.bf16.mxu0 %v3333_v3  ;;  %3185 = vmatprep.subr.bf16.mxu1 %v3333_v3 }
  0x5e   :  { %3043 = vmatpush3.bf16.msra.mxu0 %v3042_v57  ;;  %3187 = vmatpush3.bf16.msra.mxu1 %v3042_v57 }
  0x5f   :  { %3044 = vmatprep.subr.bf16.mxu0 %v3333_v3  ;;  %3188 = vmatprep.subr.bf16.mxu1 %v3333_v3 }
  0x62   :  { %3046 = vmatpush3.bf16.msra.mxu0 %v3045_v58  ;;  %3190 = vmatpush3.bf16.msra.mxu1 %v3045_v58 }
  0x63   :  { %3047 = vmatprep.subr.bf16.mxu0 %v3333_v3  ;;  %3191 = vmatprep.subr.bf16.mxu1 %v3333_v3 }
  0x65   :  { %2598 = vmatmul.mubr.f32.vlgmr.msra.gmra.mrb[0].mxu0 %v3472_v36  ;;  %2808 = vmatmul.mubr.f32.vlgmr.msra.gmra.mrb[0].mxu1 %v3496_v52 }
  0x66   :  { %3049 = vmatpush3.bf16.msra.mxu0 %v3398_v12  ;;  %3193 = vmatpush3.bf16.msra.mxu1 %v3398_v12 }
  0x67   :  { %3050 = vmatprep.subr.bf16.mxu0 %v3333_v3  ;;  %3194 = vmatprep.subr.bf16.mxu1 %v3333_v3 }
  0x68   :  { %2632 = vmatprep.mubr.msk.f32.mxu0 %vm3334_vm0, %v3335_v11  ;;  %2842 = vmatprep.mubr.msk.f32.mxu1 %vm3334_vm0, %v3335_v11 }
  0x6a   :  { %3052 = vmatpush3.bf16.msra.mxu0 %v3404_v13  ;;  %3196 = vmatpush3.bf16.msra.mxu1 %v3404_v13 }
  0x6b   :  { %3053 = vmatprep.subr.bf16.mxu0 %v3333_v3  ;;  %3197 = vmatprep.subr.bf16.mxu1 %v3333_v3 }
  0x6e   :  { %3055 = vmatpush3.bf16.msra.mxu0 %v3427_v19  ;;  %3199 = vmatpush3.bf16.msra.mxu1 %v3427_v19 }
  0x6f   :  { %3056 = vmatprep.subr.bf16.mxu0 %v3333_v3  ;;  %3200 = vmatprep.subr.bf16.mxu1 %v3333_v3 }
  0x72   :  { %3058 = vmatpush3.bf16.msra.mxu0 %v3455_v29  ;;  %3202 = vmatpush3.bf16.msra.mxu1 %v3455_v29 }
  0x73   :  { %3059 = vmatprep.subr.bf16.mxu0 %v3333_v3  ;;  %3203 = vmatprep.subr.bf16.mxu1 %v3333_v3 }
  0x76   :  { %3061 = vmatpush3.bf16.msra.mxu0 %v3482_v46  ;;  %3205 = vmatpush3.bf16.msra.mxu1 %v3482_v46 }
  0x77   :  { %3062 = vmatprep.subr.bf16.mxu0 %v3333_v3  ;;  %3206 = vmatprep.subr.bf16.mxu1 %v3333_v3 }
  0x7a   :  { %3064 = vmatpush3.bf16.msra.mxu0 %v3498_v53  ;;  %3208 = vmatpush3.bf16.msra.mxu1 %v3498_v53 }
  0x7b   :  { %3065 = vmatprep.subr.bf16.mxu0 %v3333_v3  ;;  %3209 = vmatprep.subr.bf16.mxu1 %v3333_v3 }
  0x7e   :  { %3067 = vmatpush3.bf16.msra.mxu0 %v3500_v54  ;;  %3211 = vmatpush3.bf16.msra.mxu1 %v3500_v54 }
  0x7f   :  { %3068 = vmatprep.subr.bf16.mxu0 %v3333_v3  ;;  %3212 = vmatprep.subr.bf16.mxu1 %v3333_v3 }
  0x82   :  { %3070 = vmatpush3.bf16.msra.mxu0 %v3502_v55  ;;  %3214 = vmatpush3.bf16.msra.mxu1 %v3502_v55 }
  0x83   :  { %3071 = vmatprep.subr.bf16.mxu0 %v3333_v3  ;;  %3215 = vmatprep.subr.bf16.mxu1 %v3333_v3 }
  0x85   :  { %2633 = vmatmul.mubr.f32.vlgmr.msra.gmra.mrb[0].mxu0 %v3864_v0  ;;  %2843 = vmatmul.mubr.f32.vlgmr.msra.gmra.mrb[0].mxu1 %v3865_v1 }
  0x86   :  { %3073 = vmatpush3.bf16.msra.mxu0 %v3568_v34  ;;  %3217 = vmatpush3.bf16.msra.mxu1 %v3568_v34 }
  0x87   :  { %3074 = vmatprep.subr.bf16.mxu0 %v3333_v3  ;;  %3218 = vmatprep.subr.bf16.mxu1 %v3333_v3 }
  0x88   :  { %2667 = vmatprep.mubr.msk.f32.mxu0 %vm3334_vm0, %v3335_v11  ;;  %2877 = vmatprep.mubr.msk.f32.mxu1 %vm3334_vm0, %v3335_v11 }
  0x8a   :  { %3076 = vmatpush3.bf16.msra.mxu0 %v3572_v39  ;;  %3220 = vmatpush3.bf16.msra.mxu1 %v3572_v39 }
  0x8b   :  { %3077 = vmatprep.subr.bf16.mxu0 %v3333_v3  ;;  %3221 = vmatprep.subr.bf16.mxu1 %v3333_v3 }
  0x8e   :  { %3079 = vmatpush3.bf16.msra.mxu0 %v3574_v40  ;;  %3223 = vmatpush3.bf16.msra.mxu1 %v3574_v40 }
  0x8f   :  { %3080 = vmatprep.subr.bf16.mxu0 %v3333_v3  ;;  %3224 = vmatprep.subr.bf16.mxu1 %v3333_v3 }
  0x92   :  { %3082 = vmatpush3.bf16.msra.mxu0 %v3576_v42  ;;  %3226 = vmatpush3.bf16.msra.mxu1 %v3576_v42 }
  0x93   :  { %3083 = vmatprep.subr.bf16.mxu0 %v3333_v3  ;;  %3227 = vmatprep.subr.bf16.mxu1 %v3333_v3 }
  0x96   :  { %3085 = vmatpush3.bf16.msra.mxu0 %v3578_v43  ;;  %3229 = vmatpush3.bf16.msra.mxu1 %v3578_v43 }
  0x97   :  { %3086 = vmatprep.subr.bf16.mxu0 %v3333_v3  ;;  %3230 = vmatprep.subr.bf16.mxu1 %v3333_v3 }
  0x9a   :  { %3088 = vmatpush3.bf16.msra.mxu0 %v3580_v44  ;;  %3232 = vmatpush3.bf16.msra.mxu1 %v3580_v44 }
  0x9b   :  { %3089 = vmatprep.subr.bf16.mxu0 %v3333_v3  ;;  %3233 = vmatprep.subr.bf16.mxu1 %v3333_v3 }
  0x9e   :  { %3091 = vmatpush3.bf16.msra.mxu0 %v3582_v45  ;;  %3235 = vmatpush3.bf16.msra.mxu1 %v3582_v45 }
  0x9f   :  { %3092 = vmatprep.subr.bf16.mxu0 %v3333_v3  ;;  %3236 = vmatprep.subr.bf16.mxu1 %v3333_v3 }
  0xa2   :  { %3094 = vmatpush3.bf16.msra.mxu0 %v3588_v47  ;;  %3238 = vmatpush3.bf16.msra.mxu1 %v3588_v47 }
  0xa3   :  { %3095 = vmatprep.subr.bf16.mxu0 %v3333_v3  ;;  %3239 = vmatprep.subr.bf16.mxu1 %v3333_v3 }
  0xa5   :  { %2668 = vmatmul.mubr.f32.vlgmr.msra.gmra.mrb[0].mxu0 %v3440_v24  ;;  %2878 = vmatmul.mubr.f32.vlgmr.msra.gmra.mrb[0].mxu1 %v3478_v41 }
  0xa6   :  { %3097 = vmatpush3.bf16.msra.mxu0 %v3398_v12  ;;  %3241 = vmatpush3.bf16.msra.mxu1 %v3398_v12 }
  0xa7   :  { %3098 = vmatprep.subr.bf16.mxu0 %v3333_v3  ;;  %3242 = vmatprep.subr.bf16.mxu1 %v3333_v3 }
  0xa8   :  { %2702 = vmatprep.mubr.msk.f32.mxu0 %vm3334_vm0, %v3335_v11  ;;  %2912 = vmatprep.mubr.msk.f32.mxu1 %vm3334_vm0, %v3335_v11 }
  0xaa   :  { %3100 = vmatpush3.bf16.msra.mxu0 %v3404_v13  ;;  %3244 = vmatpush3.bf16.msra.mxu1 %v3404_v13 }
  0xab   :  { %3101 = vmatprep.subr.bf16.mxu0 %v3333_v3  ;;  %3245 = vmatprep.subr.bf16.mxu1 %v3333_v3 }
  0xae   :  { %3103 = vmatpush3.bf16.msra.mxu0 %v3427_v19  ;;  %3247 = vmatpush3.bf16.msra.mxu1 %v3427_v19 }
  0xaf   :  { %3104 = vmatprep.subr.bf16.mxu0 %v3333_v3  ;;  %3248 = vmatprep.subr.bf16.mxu1 %v3333_v3 }
  0xb2   :  { %3106 = vmatpush3.bf16.msra.mxu0 %v3455_v29  ;;  %3250 = vmatpush3.bf16.msra.mxu1 %v3455_v29 }
  0xb3   :  { %3107 = vmatprep.subr.bf16.mxu0 %v3333_v3  ;;  %3251 = vmatprep.subr.bf16.mxu1 %v3333_v3 }
  0xb6   :  { %3109 = vmatpush3.bf16.msra.mxu0 %v3482_v46  ;;  %3253 = vmatpush3.bf16.msra.mxu1 %v3482_v46 }
  0xb7   :  { %3110 = vmatprep.subr.bf16.mxu0 %v3333_v3  ;;  %3254 = vmatprep.subr.bf16.mxu1 %v3333_v3 }
  0xba   :  { %3112 = vmatpush3.bf16.msra.mxu0 %v3498_v53  ;;  %3256 = vmatpush3.bf16.msra.mxu1 %v3498_v53 }
  0xbb   :  { %3113 = vmatprep.subr.bf16.mxu0 %v3333_v3  ;;  %3257 = vmatprep.subr.bf16.mxu1 %v3333_v3 }
  0xbe   :  { %3115 = vmatpush3.bf16.msra.mxu0 %v3500_v54  ;;  %3259 = vmatpush3.bf16.msra.mxu1 %v3500_v54 }
  0xbf   :  { %3116 = vmatprep.subr.bf16.mxu0 %v3333_v3  ;;  %3260 = vmatprep.subr.bf16.mxu1 %v3333_v3  ;;  %v38_v3 = vld [vmem:[%s3858_s4] sm:$0xf] }
  0xc0   :  { %v1335_v12 = vsel %vm1333_vm1, %v38_v3, 0 }
  0xc1   :  { %v3794_v13 = vand.u32 4294901760, %v1335_v12 }
  0xc2   :  { %3118 = vmatpush3.bf16.msra.mxu0 %v3502_v55  ;;  %3262 = vmatpush3.bf16.msra.mxu1 %v3502_v55 }
  0xc3   :  { %2915 = vmatprep.subr.mxu0 %v3335_v11  ;;  %2945 = vmatprep.subr.mxu1 %v3335_v11  ;;  %v1415_v19 = vsub.f32 %v1335_v12, %v3794_v13 }
  0xc5   :  { %2703 = vmatmul.mubr.f32.vlgmr.msra.gmra.mrb[0].mxu0 %v3440_v24  ;;  %2913 = vmatmul.mubr.f32.vlgmr.msra.gmra.mrb[0].mxu1 %v3478_v41  ;;  %v1416_v55 = vand.u32 4294901760, %v1415_v19 }
  0xc6   :  { %2917 = vmatprep.mubr.msk.f32.mxu0 %vm3334_vm0, %v3335_v11  ;;  %2947 = vmatprep.mubr.msk.f32.mxu1 %vm3334_vm0, %v3335_v11 }
  0xc7   :  { %2916 = vmatpush3.msra.mxu0 %v3794_v13  ;;  %2946 = vmatpush3.msra.mxu1 %v3794_v13  ;;  %v1417_v7 = vsub.f32 %v1415_v19, %v1416_v55 }
  0xc8   :  { %2920 = vmatprep.subr.mxu0 %v3335_v11  ;;  %2950 = vmatprep.subr.mxu1 %v3335_v11 }
  0xc9   :  { %v1418_v34 = vand.u32 4294901760, %v1417_v7 }
 0x198   :  { %v676_v24 = vpop.f32.mrb[0].mxu0  ;;  %v1318_v29 = vpop.f32.mrb[0].mxu1 }
 0x199   :  { %v1322_v36 = vmul.f32 0.03125, %v676_v24  ;;  %v2704_v41 = vpop.f32.mrb[1].mxu0  ;;  %v2914_v46 = vpop.f32.mrb[1].mxu1  ;;  %v1323_v54 = vmul.f32 0.03125, %v1318_v29 }
 0x19b   :  { %v1324_v52 = vmul.f32 %v1322_v36, %v1322_v36  ;;  %v1331_v53 = vsel %vm1329_vm2, %v1322_v36, 0 }
 0x19c   :  { %v1403_v2 = vand.u32 4294901760, %v1331_v53 }
 0x19d   :  { %v1325_v4 = vsub.f32 %v1323_v54, %v1324_v52 }
 0x19e   :  { %v1404_v5 = vsub.f32 %v1331_v53, %v1403_v2 }
 0x19f   :  { %v1326_v6 = vmax.f32 %v1325_v4, 0.0 }
 0x1a0   :  { %v1405_v9 = vand.u32 4294901760, %v1404_v5 }
 0x1a1   :  { %v1327_v10 = vadd.f32 1e-06, %v1326_v6 }
 0x1a2   :  { %v1406_v14 = vsub.f32 %v1404_v5, %v1405_v9 }
 0x1a3   :  { %3307 = vrsqrt.f32 %v1327_v10 }
 0x1a4   :  { %v1407_v39 = vand.u32 4294901760, %v1406_v14 }
 0x1a6   :  { %2918 = vmatmul.mubr.f32.vlgmr.msra.gmra.mrb[2].mxu0 %v1407_v39 }
 0x1a7   :  { %2921 = vmatpush3.msra.mxu0 %v1418_v34  ;;  %2922 = vmatprep.mubr.msk.f32.mxu0 %vm3334_vm0, %v3335_v11 }
 0x1a8   :  { %2925 = vmatprep.subr.mxu0 %v3335_v11 }
 0x1ad   :  { %v3308_v40 = vpop.eup %3307 }
 0x1ae   :  { %2923 = vmatmul.mubr.f32.vlgmr.msra.gmra.mrb[2].mxu0 %v1403_v2  ;;  %v1784_v42 = vsel %vm1329_vm2, %v3308_v40, 0 }
 0x1af   :  { %2926 = vmatpush3.msra.mxu0 %v1415_v19  ;;  %2927 = vmatprep.mubr.msk.f32.mxu0 %vm3334_vm0, %v3335_v11  ;;  %v1852_v43 = vand.u32 4294901760, %v1784_v42 }
 0x1b0   :  { %2930 = vmatprep.subr.mxu0 %v3335_v11 }
 0x1b1   :  { %v1853_v44 = vsub.f32 %v1784_v42, %v1852_v43 }
 0x1b3   :  { %v1854_v45 = vand.u32 4294901760, %v1853_v44 }
 0x1b5   :  { %v1855_v47 = vsub.f32 %v1853_v44, %v1854_v45 }
 0x1b6   :  { %2928 = vmatmul.mubr.f32.vlgmr.msra.gmra.mrb[2].mxu0 %v1404_v5 }
 0x1b7   :  { %v1856_v16 = vand.u32 4294901760, %v1855_v47  ;;  %2931 = vmatpush3.msra.mxu0 %v3794_v13  ;;  %2932 = vmatprep.mubr.msk.f32.mxu0 %vm3334_vm0, %v3335_v11 }
 0x1b8   :  { %2935 = vmatprep.subr.mxu0 %v3335_v11 }
 0x1b9   :  { %2948 = vmatmul.mubr.f32.vlgmr.msra.gmra.mrb[2].mxu1 %v1856_v16 }
 0x1ba   :  { %2951 = vmatpush3.msra.mxu1 %v1418_v34  ;;  %2952 = vmatprep.mubr.msk.f32.mxu1 %vm3334_vm0, %v3335_v11 }
 0x1bb   :  { %2955 = vmatprep.subr.mxu1 %v3335_v11 }
 0x1be   :  { %2933 = vmatmul.mubr.f32.vlgmr.msra.gmra.mrb[2].mxu0 %v1405_v9 }
 0x1bf   :  { %2936 = vmatpush3.msra.mxu0 %v1416_v55  ;;  %2937 = vmatprep.mubr.msk.f32.mxu0 %vm3334_vm0, %v3335_v11 }
 0x1c0   :  { %2940 = vmatprep.subr.mxu0 %v3335_v11 }
 0x1c1   :  { %2953 = vmatmul.mubr.f32.vlgmr.msra.gmra.mrb[2].mxu1 %v1852_v43 }
 0x1c2   :  { %2956 = vmatpush3.msra.mxu1 %v1415_v19  ;;  %2957 = vmatprep.mubr.msk.f32.mxu1 %vm3334_vm0, %v3335_v11 }
 0x1c3   :  { %2960 = vmatprep.subr.mxu1 %v3335_v11 }
 0x1c6   :  { %2938 = vmatmul.mubr.f32.vlgmr.msra.gmra.mrb[2].mxu0 %v1403_v2 }
 0x1c7   :  { %2941 = vmatpush3.msra.mxu0 %v3794_v13  ;;  %2942 = vmatprep.mubr.msk.f32.mxu0 %vm3334_vm0, %v3335_v11 }
 0x1c9   :  { %2958 = vmatmul.mubr.f32.vlgmr.msra.gmra.mrb[2].mxu1 %v1853_v44 }
 0x1ca   :  { %2961 = vmatpush3.msra.mxu1 %v3794_v13  ;;  %2962 = vmatprep.mubr.msk.f32.mxu1 %vm3334_vm0, %v3335_v11 }
 0x1cb   :  { %2965 = vmatprep.subr.mxu1 %v3335_v11 }
 0x1ce   :  { %2943 = vmatmul.mubr.f32.vlgmr.msra.gmra.mrb[2].mxu0 %v1403_v2 }
 0x1d1   :  { %2963 = vmatmul.mubr.f32.vlgmr.msra.gmra.mrb[2].mxu1 %v1854_v45 }
 0x1d2   :  { %2966 = vmatpush3.msra.mxu1 %v1416_v55  ;;  %2967 = vmatprep.mubr.msk.f32.mxu1 %vm3334_vm0, %v3335_v11 }
 0x1d3   :  { %2970 = vmatprep.subr.mxu1 %v3335_v11 }
 0x1d9   :  { %2968 = vmatmul.mubr.f32.vlgmr.msra.gmra.mrb[2].mxu1 %v1852_v43 }
 0x1da   :  { %2971 = vmatpush3.msra.mxu1 %v3794_v13  ;;  %2972 = vmatprep.mubr.msk.f32.mxu1 %vm3334_vm0, %v3335_v11 }
 0x1e1   :  { %2973 = vmatmul.mubr.f32.vlgmr.msra.gmra.mrb[2].mxu1 %v1852_v43 }
 0x2a1   :  { %v1779_v48 = vpop.f32.mrb[2].mxu0 }
 0x2a2   :  { %v2944_v63 = vpop.f32.mrb[3].mxu0  ;;  %v2240_v23 = vsub.f32 %v3423_v18, %v1779_v48 }
 0x2b4   :  { %v2228_v22 = vpop.f32.mrb[2].mxu1 }
 0x2b5   :  { %v2239_v49 = vmul.f32 %v2265_v17, %v2228_v22  ;;  %v2974_v56 = vpop.f32.mrb[3].mxu1 }
 0x2b7   :  { %v2241_v26 = vmul.f32 %v2240_v23, %v2239_v49 }
 0x2b9   :  { %v2249_v11 = vadd.f32 %v2266_v25, %v2241_v26 }
 0x2bb   :  { %2250 = vst [vmem:[#allocation2] sm:$0xf] %v2249_v11 }
 0x2bc   :  { %3320 = shalt.err (!%p3317_p4)
}
 0x2bd   :  { %s3321_s9 = scalar_lea.hbm %s3859_s5, 64 }
 0x2be   :  { %p3322_p5 = scmp.ne.s32.totalorder %s3859_s5, %s3321_s9  ;;  %p3325_p6 = scmp.lt.u32.totalorder %s3321_s9, %s3859_s5 }
 0x2c0   :  { %p3327_p7 = pnand %p3325_p6, %p3322_p5 }
 0x2c2   :  { %3330 = shalt.err (!%p3327_p7)
}
 0x2c3   :  { %2260 = dma.vmem_to_hbm [thread:$0]  %s2258_s6, 64, %s3859_s5, [#allocation3]  }
 0x2c4   :  { %3331 = dma.done.wait [#allocation3], 64  }
 0x2c5   :  { %3332 = vsyncadd [#allocation3], 4294967232 }
 0x2c6   :  { %2264 = vsyncpa [#allocation3], 1 }

</bundles_post_ra>
